<compile_context>
chip_gen: v7x
topology: tpu7x:2x2x1
jax: 0.10.0
libtpu: 0.0.40
codegen_flags: <defaults>
</compile_context>

<pallas_src>
import functools

import numpy as np

import jax
import jax.numpy as jnp
from jax.experimental import pallas as pl
from jax.experimental.pallas import tpu as pltpu

_EPS = 1e-5  # PyTorch BatchNorm2d default


# --------------------------- host-side weight prep ----------------------------
def _band_weights(w_hwio, W):
    """Fold a (3,3,Cin,Cout) HWIO conv kernel into 3 banded block matrices.

    Returns (3, W*Cin, W*Cout) where band[kh, w*Cin+ci, w2*Cout+co] equals
    w_hwio[kh, w-w2+1, ci, co] for |w-w2| <= 1 and 0 otherwise, so that a
    3x3/stride-1/pad-1 conv in the lane-dense (N*H, W*C) layout is just
        out = sum_kh row_shift_kh(x2) @ band[kh]
    i.e. the kw taps are absorbed into the weight (full-K MXU matmuls).
    """
    _, _, Cin, Cout = w_hwio.shape
    w_in = jnp.arange(W)[:, None]              # input column  w
    w_out = jnp.arange(W)[None, :]             # output column w2
    kw = w_in - w_out + 1                      # tap index per (w, w2)
    valid = (kw >= 0) & (kw <= 2)
    blocks = w_hwio[:, jnp.clip(kw, 0, 2)]                      # (3, W, W, Cin, Cout)
    blocks = jnp.where(valid[None, :, :, None, None], blocks, 0.0)
    blocks = jnp.transpose(blocks, (0, 1, 3, 2, 4))             # (3, W, Cin, W, Cout)
    return blocks.reshape(3, W * Cin, W * Cout)


# --------------------------------- the kernel ---------------------------------
def _residual_kernel(x_ref, w1_ref, w2_ref, g1_ref, be1_ref, g2_ref, be2_ref,
                     fold_ref, spread_ref, *rest,
                     N, H, W, Cin, Cout, use_1x1conv, fuse1, fuse2):
    if use_1x1conv:
        b3_ref, out_ref = rest
    else:
        (out_ref,) = rest

    NH = N * H
    WCo = W * Cout

    fold = fold_ref[...]                         # (W*Cout, Cout), 1/M baked in
    spread = spread_ref[...]                     # (Cout, W*Cout)

    def halo(a):
        """Row h-1 / h+1 neighbours of each image (zero rows at image edges)."""
        C = a.shape[-1]
        a3 = a.reshape(N, H, C)
        zrow = jnp.zeros_like(a3[:, :1])
        up = jnp.concatenate([zrow, a3[:, :H - 1]], axis=1).reshape(NH, C)
        dn = jnp.concatenate([a3[:, 1:], zrow], axis=1).reshape(NH, C)
        return up, dn

    def conv3x3(a, w_ref_, fused):
        """3x3 conv in the (N*H, W*C) layout.

        fused=True : ONE bf16 MXU matmul, LHS (N*H, 3*W*C) vs stacked weight.
        fused=False: three per-tap matmuls (unaligned lane widths fall back here).
        """
        up, dn = halo(a)
        if fused:
            lhs = jnp.concatenate([up, a, dn], axis=-1).astype(jnp.bfloat16)
            return jnp.dot(lhs, w_ref_[...], preferred_element_type=jnp.float32)
        acc = jnp.dot(up.astype(jnp.bfloat16), w_ref_[0],
                      preferred_element_type=jnp.float32)
        acc = acc + jnp.dot(a.astype(jnp.bfloat16), w_ref_[1],
                            preferred_element_type=jnp.float32)
        acc = acc + jnp.dot(dn.astype(jnp.bfloat16), w_ref_[2],
                            preferred_element_type=jnp.float32)
        return acc

    def batchnorm(acc, g, be):
        """Train-mode BN: stacked one-pass stats (2 tiny matmuls), FMA apply."""
        col_sum = jnp.sum(acc, axis=0, keepdims=True)            # (1, W*Cout)
        col_sq = jnp.sum(acc * acc, axis=0, keepdims=True)       # (1, W*Cout)
        stats = jnp.dot(jnp.concatenate([col_sum, col_sq], axis=0), fold,
                        preferred_element_type=jnp.float32)      # (2, Cout)
        mean = stats[0:1, :]
        ex2 = stats[1:2, :]
        var = jnp.maximum(ex2 - mean * mean, 0.0)                # clamp (review)
        scale = g * jax.lax.rsqrt(var + _EPS)                    # (1, Cout)
        shift = be - mean * scale
        ss = jnp.dot(jnp.concatenate([scale, shift], axis=0), spread,
                     preferred_element_type=jnp.float32)         # (2, W*Cout)
        return acc * ss[0:1, :] + ss[1:2, :]

    x2 = x_ref[...]                              # (N*H, W*Cin) f32, lane-dense

    # conv1 (+ folded 1x1 shortcut columns when use_1x1conv)
    acc1 = conv3x3(x2, w1_ref, fuse1)            # (N*H, W*Cout) or (N*H, 2*W*Cout)
    if use_1x1conv:
        y1_in = acc1[:, :WCo]                    # 128-aligned lane slices
        shortcut = acc1[:, WCo:] + b3_ref[...]   # 1x1 projection + its bias
    else:
        y1_in = acc1
        shortcut = x2                            # identity path (Cin == Cout)

    # bn1 -> relu   (conv bias dropped: cancelled exactly by train-mode BN)
    y1 = jnp.maximum(batchnorm(y1_in, g1_ref[...], be1_ref[...]), 0.0)

    # conv2 -> bn2
    y2 = batchnorm(conv3x3(y1, w2_ref, fuse2), g2_ref[...], be2_ref[...])

    # residual add + relu, stored lane-dense (unmasked 128-lane store)
    out_ref[...] = jnp.maximum(y2 + shortcut, 0.0)


# --------------------------------- the wrapper ---------------------------------
@functools.partial(jax.jit, static_argnames=("use_1x1conv",))
def residual_forward(x_nchw, params, use_1x1conv=False):
    """Fused Residual-block forward.  x_nchw: (N, Cin, H, W) f32 -> (N, Cout, H, W)."""
    x = jnp.transpose(x_nchw, (0, 2, 3, 1)).astype(jnp.float32)    # -> NHWC
    N, H, W, Cin = x.shape
    Cout = params["w1"].shape[-1]
    if not use_1x1conv:
        assert Cin == Cout, "identity shortcut requires input_channels == num_channels"
    NH, WCi, WCo = N * H, W * Cin, W * Cout
    M = N * H * W

    x2 = x.reshape(NH, WCi)                                        # lane-dense input

    # Fuse the 3 kh-tap matmuls into one whenever the per-tap lane width is
    # 128-aligned (always true at real ResNet sizes; demo projection conv1 is not).
    fuse1 = (WCi % 128) == 0
    fuse2 = (WCo % 128) == 0

    # Conv weights folded host-side into banded block matrices (bf16 for the MXU).
    w1b = _band_weights(params["w1"], W)                           # (3, W*Cin, W*Cout)
    if use_1x1conv:
        # Fold the 1x1 projection into conv1 as extra output columns carried by
        # the center tap (taps 0/2 get zero columns there).
        w3b = jnp.kron(jnp.eye(W, dtype=jnp.float32), params["w3"])   # (W*Cin, W*Cout)
        sc_cols = jnp.stack([jnp.zeros_like(w3b), w3b, jnp.zeros_like(w3b)])
        w1b = jnp.concatenate([w1b, sc_cols], axis=-1)             # (3, W*Cin, 2*W*Cout)
    ncols1 = w1b.shape[-1]
    w1in = (w1b.reshape(3 * WCi, ncols1) if fuse1 else w1b).astype(jnp.bfloat16)

    w2b = _band_weights(params["w2"], W)                           # (3, W*Cout, W*Cout)
    w2in = (w2b.reshape(3 * WCo, WCo) if fuse2 else w2b).astype(jnp.bfloat16)

    # Compile-time constant fold / broadcast matrices for BN stats in lane space
    # (numpy -> embedded constants: no per-call device kron/eye construction).
    eye = np.eye(Cout, dtype=np.float32)
    fold = np.kron(np.ones((W, 1), np.float32), eye) / M           # (W*Cout, Cout)
    spread = np.kron(np.ones((1, W), np.float32), eye)             # (Cout, W*Cout)

    inputs = [x2, w1in, w2in,
              params["g1"], params["be1"], params["g2"], params["be2"],
              jnp.asarray(fold), jnp.asarray(spread)]
    if use_1x1conv:
        inputs.append(jnp.tile(params["b3"], (1, W)))              # (1, W*Cout)

    kern = functools.partial(_residual_kernel, N=N, H=H, W=W, Cin=Cin, Cout=Cout,
                             use_1x1conv=use_1x1conv, fuse1=fuse1, fuse2=fuse2)

    in_specs = [pl.BlockSpec(a.shape, lambda i, nd=a.ndim: (0,) * nd) for a in inputs]

    out2d = pl.pallas_call(
        kern,
        out_shape=jax.ShapeDtypeStruct((NH, WCo), jnp.float32),    # lane-dense output
        grid=(1,),
        in_specs=in_specs,
        out_specs=pl.BlockSpec((NH, WCo), lambda i: (0, 0)),
        compiler_params=pltpu.CompilerParams(dimension_semantics=("arbitrary",)),
    )(*inputs)

    return jnp.transpose(out2d.reshape(N, H, W, Cout), (0, 3, 1, 2))   # -> NCHW


# ----------------------------- pure-JAX reference -----------------------------
def _conv_nhwc(x, w, b, stride=1, padding=1):
    out = jax.lax.conv_general_dilated(
        x, w, window_strides=(stride, stride),
        padding=((padding, padding), (padding, padding)),
        dimension_numbers=("NHWC", "HWIO", "NHWC"),
        precision=jax.lax.Precision.HIGHEST)
    return out + b.reshape(1, 1, 1, -1)


def _bn_train(y, gamma, beta):
    mean = y.mean(axis=(0, 1, 2))
    var = ((y - mean) ** 2).mean(axis=(0, 1, 2))
    return (y - mean) / jnp.sqrt(var + _EPS) * gamma + beta


def residual_ref(x_nchw, params, use_1x1conv=False):
    # Reference keeps the conv biases b1/b2 (like the PyTorch module); the kernel
    # drops them because train-mode BN cancels a constant per-channel bias.
    x = jnp.transpose(x_nchw, (0, 2, 3, 1)).astype(jnp.float32)
    Cin = x.shape[-1]
    Cout = params["w1"].shape[-1]
    y = _conv_nhwc(x, params["w1"], params["b1"].reshape(-1))
    y = jax.nn.relu(_bn_train(y, params["g1"].reshape(-1), params["be1"].reshape(-1)))
    y = _conv_nhwc(y, params["w2"], params["b2"].reshape(-1))
    y = _bn_train(y, params["g2"].reshape(-1), params["be2"].reshape(-1))
    if use_1x1conv:
        x = _conv_nhwc(x, params["w3"].reshape(1, 1, Cin, Cout),
                       params["b3"].reshape(-1), padding=0)
    out = jax.nn.relu(y + x)
    return jnp.transpose(out, (0, 3, 1, 2))


# ----------------------------- parameter init ---------------------------------
def init_params(key, input_channels, num_channels, use_1x1conv=False):
    ks = jax.random.split(key, 6)
    p = {
        # conv weights stored HWIO (kh, kw, Cin, Cout)
        "w1": jax.random.normal(ks[0], (3, 3, input_channels, num_channels), jnp.float32) * 0.1,
        "b1": jax.random.normal(ks[1], (1, num_channels), jnp.float32) * 0.1,
        "w2": jax.random.normal(ks[2], (3, 3, num_channels, num_channels), jnp.float32) * 0.1,
        "b2": jax.random.normal(ks[3], (1, num_channels), jnp.float32) * 0.1,
        # BatchNorm2d init: weight=1, bias=0
        "g1": jnp.ones((1, num_channels), jnp.float32),
        "be1": jnp.zeros((1, num_channels), jnp.float32),
        "g2": jnp.ones((1, num_channels), jnp.float32),
        "be2": jnp.zeros((1, num_channels), jnp.float32),
    }
    if use_1x1conv:
        p["w3"] = jax.random.normal(ks[4], (input_channels, num_channels), jnp.float32) * 0.1
        p["b3"] = jax.random.normal(ks[5], (1, num_channels), jnp.float32) * 0.1
    return p


if __name__ == "__main__":
    key = jax.random.PRNGKey(0)
    k_x1, k_p1, k_x2, k_p2 = jax.random.split(key, 4)

    # Config A: Residual(8, 8) -- identity shortcut (fully tap-fused convs).
    x_a = jax.random.normal(k_x1, (2, 8, 16, 16), jnp.float32)     # NCHW
    params_a = init_params(k_p1, 8, 8, use_1x1conv=False)
    out_a = jax.block_until_ready(residual_forward(x_a, params_a, use_1x1conv=False))
    ref_a = residual_ref(x_a, params_a, use_1x1conv=False)
    assert out_a.shape == (2, 8, 16, 16)
    # bf16 MXU inputs (f32 accumulation) => ~1e-3 relative error vs the f32 reference
    assert jnp.allclose(out_a, ref_a, rtol=2e-2, atol=2e-2), (
        "mismatch (identity shortcut): max abs err = "
        f"{float(jnp.max(jnp.abs(out_a - ref_a)))}")

    # Config B: Residual(4, 8, use_1x1conv=True) -- projection shortcut folded
    # into conv1's output columns (conv1 taps unfused: W*Cin=64 not lane-aligned).
    x_b = jax.random.normal(k_x2, (2, 4, 16, 16), jnp.float32)     # NCHW
    params_b = init_params(k_p2, 4, 8, use_1x1conv=True)
    out_b = jax.block_until_ready(residual_forward(x_b, params_b, use_1x1conv=True))
    ref_b = residual_ref(x_b, params_b, use_1x1conv=True)
    assert out_b.shape == (2, 8, 16, 16)
    assert jnp.allclose(out_b, ref_b, rtol=2e-2, atol=2e-2), (
        "mismatch (1x1 projection): max abs err = "
        f"{float(jnp.max(jnp.abs(out_b - ref_b)))}")

    print("KERNEL_OK")
</pallas_src>

<mosaic_0001>
module attributes {stable_mosaic.version = 11 : i64} {
  func.func @_residual_kernel(%arg0: i32, %arg1: memref<32x128xf32, #tpu.memory_space<vmem>>, %arg2: memref<384x128xbf16, #tpu.memory_space<vmem>>, %arg3: memref<384x128xbf16, #tpu.memory_space<vmem>>, %arg4: memref<1x8xf32, #tpu.memory_space<vmem>>, %arg5: memref<1x8xf32, #tpu.memory_space<vmem>>, %arg6: memref<1x8xf32, #tpu.memory_space<vmem>>, %arg7: memref<1x8xf32, #tpu.memory_space<vmem>>, %arg8: memref<128x8xf32, #tpu.memory_space<vmem>>, %arg9: memref<8x128xf32, #tpu.memory_space<vmem>>, %arg10: memref<32x128xf32, #tpu.memory_space<vmem>>) attributes {dimension_semantics = [#tpu.dimension_semantics<arbitrary>], iteration_bounds = array<i64: 1>, scalar_prefetch = 0 : i64, scratch_operands = 0 : i64, tpu.core_type = #tpu.core_type<tc>, window_params = [{pipeline_mode = #tpu.pipeline_mode<synchronous>, transform_indices = @transform_0, window_bounds = array<i64: 32, 128>}, {pipeline_mode = #tpu.pipeline_mode<synchronous>, transform_indices = @transform_1, window_bounds = array<i64: 384, 128>}, {pipeline_mode = #tpu.pipeline_mode<synchronous>, transform_indices = @transform_2, window_bounds = array<i64: 384, 128>}, {pipeline_mode = #tpu.pipeline_mode<synchronous>, transform_indices = @transform_3, window_bounds = array<i64: 1, 8>}, {pipeline_mode = #tpu.pipeline_mode<synchronous>, transform_indices = @transform_4, window_bounds = array<i64: 1, 8>}, {pipeline_mode = #tpu.pipeline_mode<synchronous>, transform_indices = @transform_5, window_bounds = array<i64: 1, 8>}, {pipeline_mode = #tpu.pipeline_mode<synchronous>, transform_indices = @transform_6, window_bounds = array<i64: 1, 8>}, {pipeline_mode = #tpu.pipeline_mode<synchronous>, transform_indices = @transform_7, window_bounds = array<i64: 128, 8>}, {pipeline_mode = #tpu.pipeline_mode<synchronous>, transform_indices = @transform_8, window_bounds = array<i64: 8, 128>}, {pipeline_mode = #tpu.pipeline_mode<synchronous>, transform_indices = @transform_9, window_bounds = array<i64: 32, 128>}]} {
    %c0 = arith.constant 0 : index
    %c0_0 = arith.constant 0 : index
    %0 = vector.load %arg8[%c0, %c0_0] : memref<128x8xf32, #tpu.memory_space<vmem>>, vector<128x8xf32>
    %c0_1 = arith.constant 0 : index
    %c0_2 = arith.constant 0 : index
    %1 = vector.load %arg9[%c0_1, %c0_2] : memref<8x128xf32, #tpu.memory_space<vmem>>, vector<8x128xf32>
    %c0_3 = arith.constant 0 : index
    %c0_4 = arith.constant 0 : index
    %2 = vector.load %arg1[%c0_3, %c0_4] : memref<32x128xf32, #tpu.memory_space<vmem>>, vector<32x128xf32>
    %3 = vector.shape_cast %2 : vector<32x128xf32> to vector<2x16x128xf32>
    %cst = arith.constant 0.000000e+00 : f32
    %4 = vector.broadcast %cst : f32 to vector<2x1x128xf32>
    %5 = vector.extract_strided_slice %3 {offsets = [0, 0, 0], sizes = [2, 15, 128], strides = [1, 1, 1]} : vector<2x16x128xf32> to vector<2x15x128xf32>
    %6 = tpu.concatenate %4, %5 in 1 : vector<2x1x128xf32>, vector<2x15x128xf32> -> vector<2x16x128xf32>
    %7 = vector.shape_cast %6 : vector<2x16x128xf32> to vector<32x128xf32>
    %8 = vector.extract_strided_slice %3 {offsets = [0, 1, 0], sizes = [2, 15, 128], strides = [1, 1, 1]} : vector<2x16x128xf32> to vector<2x15x128xf32>
    %9 = tpu.concatenate %8, %4 in 1 : vector<2x15x128xf32>, vector<2x1x128xf32> -> vector<2x16x128xf32>
    %10 = vector.shape_cast %9 : vector<2x16x128xf32> to vector<32x128xf32>
    %11 = tpu.concatenate %7, %2, %10 in 1 : vector<32x128xf32>, vector<32x128xf32>, vector<32x128xf32> -> vector<32x384xf32>
    %12 = arith.truncf %11 : vector<32x384xf32> to vector<32x384xbf16>
    %c0_5 = arith.constant 0 : index
    %c0_6 = arith.constant 0 : index
    %13 = vector.load %arg2[%c0_5, %c0_6] : memref<384x128xbf16, #tpu.memory_space<vmem>>, vector<384x128xbf16>
    %cst_7 = arith.constant dense<0.000000e+00> : vector<32x128xf32>
    %14 = tpu.matmul %12, %13, %cst_7 {dimension_numbers = #tpu.dot_dimension_numbers<[1], [0], [0], [1], [0, 0, 1, 1], [], []>} : vector<32x384xbf16>, vector<384x128xbf16>, vector<32x128xf32> -> vector<32x128xf32>
    %c0_8 = arith.constant 0 : index
    %c0_9 = arith.constant 0 : index
    %15 = vector.load %arg4[%c0_8, %c0_9] : memref<1x8xf32, #tpu.memory_space<vmem>>, vector<1x8xf32>
    %c0_10 = arith.constant 0 : index
    %c0_11 = arith.constant 0 : index
    %16 = vector.load %arg5[%c0_10, %c0_11] : memref<1x8xf32, #tpu.memory_space<vmem>>, vector<1x8xf32>
    %cst_12 = arith.constant dense<0.000000e+00> : vector<128xf32>
    %17 = vector.multi_reduction <add>, %14, %cst_12 [0] : vector<32x128xf32> to vector<128xf32>
    %18 = vector.shape_cast %17 : vector<128xf32> to vector<1x128xf32>
    %19 = arith.mulf %14, %14 : vector<32x128xf32>
    %cst_13 = arith.constant dense<0.000000e+00> : vector<128xf32>
    %20 = vector.multi_reduction <add>, %19, %cst_13 [0] : vector<32x128xf32> to vector<128xf32>
    %21 = vector.shape_cast %20 : vector<128xf32> to vector<1x128xf32>
    %22 = tpu.concatenate %18, %21 in 0 : vector<1x128xf32>, vector<1x128xf32> -> vector<2x128xf32>
    %cst_14 = arith.constant dense<0.000000e+00> : vector<2x8xf32>
    %23 = tpu.matmul %22, %0, %cst_14 {dimension_numbers = #tpu.dot_dimension_numbers<[1], [0], [0], [1], [0, 0, 1, 1], [], []>} : vector<2x128xf32>, vector<128x8xf32>, vector<2x8xf32> -> vector<2x8xf32>
    %24 = vector.extract_strided_slice %23 {offsets = [0, 0], sizes = [1, 8], strides = [1, 1]} : vector<2x8xf32> to vector<1x8xf32>
    %25 = vector.extract_strided_slice %23 {offsets = [1, 0], sizes = [1, 8], strides = [1, 1]} : vector<2x8xf32> to vector<1x8xf32>
    %26 = arith.mulf %24, %24 : vector<1x8xf32>
    %27 = arith.subf %25, %26 : vector<1x8xf32>
    %cst_15 = arith.constant 0.000000e+00 : f32
    %28 = vector.broadcast %cst_15 : f32 to vector<1x8xf32>
    %29 = arith.maximumf %27, %28 : vector<1x8xf32>
    %cst_16 = arith.constant 9.99999974E-6 : f32
    %30 = vector.broadcast %cst_16 : f32 to vector<1x8xf32>
    %31 = arith.addf %29, %30 : vector<1x8xf32>
    %32 = math.rsqrt %31 : vector<1x8xf32>
    %33 = arith.mulf %15, %32 : vector<1x8xf32>
    %34 = arith.mulf %24, %33 : vector<1x8xf32>
    %35 = arith.subf %16, %34 : vector<1x8xf32>
    %36 = tpu.concatenate %33, %35 in 0 : vector<1x8xf32>, vector<1x8xf32> -> vector<2x8xf32>
    %cst_17 = arith.constant dense<0.000000e+00> : vector<2x128xf32>
    %37 = tpu.matmul %36, %1, %cst_17 {dimension_numbers = #tpu.dot_dimension_numbers<[1], [0], [0], [1], [0, 0, 1, 1], [], []>} : vector<2x8xf32>, vector<8x128xf32>, vector<2x128xf32> -> vector<2x128xf32>
    %38 = vector.extract_strided_slice %37 {offsets = [0, 0], sizes = [1, 128], strides = [1, 1]} : vector<2x128xf32> to vector<1x128xf32>
    %39 = vector.broadcast %38 : vector<1x128xf32> to vector<32x128xf32>
    %40 = arith.mulf %14, %39 : vector<32x128xf32>
    %41 = vector.extract_strided_slice %37 {offsets = [1, 0], sizes = [1, 128], strides = [1, 1]} : vector<2x128xf32> to vector<1x128xf32>
    %42 = vector.broadcast %41 : vector<1x128xf32> to vector<32x128xf32>
    %43 = arith.addf %40, %42 : vector<32x128xf32>
    %cst_18 = arith.constant 0.000000e+00 : f32
    %44 = vector.broadcast %cst_18 : f32 to vector<32x128xf32>
    %45 = arith.maximumf %43, %44 : vector<32x128xf32>
    %46 = vector.shape_cast %45 : vector<32x128xf32> to vector<2x16x128xf32>
    %cst_19 = arith.constant 0.000000e+00 : f32
    %47 = vector.broadcast %cst_19 : f32 to vector<2x1x128xf32>
    %48 = vector.extract_strided_slice %46 {offsets = [0, 0, 0], sizes = [2, 15, 128], strides = [1, 1, 1]} : vector<2x16x128xf32> to vector<2x15x128xf32>
    %49 = tpu.concatenate %47, %48 in 1 : vector<2x1x128xf32>, vector<2x15x128xf32> -> vector<2x16x128xf32>
    %50 = vector.shape_cast %49 : vector<2x16x128xf32> to vector<32x128xf32>
    %51 = vector.extract_strided_slice %46 {offsets = [0, 1, 0], sizes = [2, 15, 128], strides = [1, 1, 1]} : vector<2x16x128xf32> to vector<2x15x128xf32>
    %52 = tpu.concatenate %51, %47 in 1 : vector<2x15x128xf32>, vector<2x1x128xf32> -> vector<2x16x128xf32>
    %53 = vector.shape_cast %52 : vector<2x16x128xf32> to vector<32x128xf32>
    %54 = tpu.concatenate %50, %45, %53 in 1 : vector<32x128xf32>, vector<32x128xf32>, vector<32x128xf32> -> vector<32x384xf32>
    %55 = arith.truncf %54 : vector<32x384xf32> to vector<32x384xbf16>
    %c0_20 = arith.constant 0 : index
    %c0_21 = arith.constant 0 : index
    %56 = vector.load %arg3[%c0_20, %c0_21] : memref<384x128xbf16, #tpu.memory_space<vmem>>, vector<384x128xbf16>
    %cst_22 = arith.constant dense<0.000000e+00> : vector<32x128xf32>
    %57 = tpu.matmul %55, %56, %cst_22 {dimension_numbers = #tpu.dot_dimension_numbers<[1], [0], [0], [1], [0, 0, 1, 1], [], []>} : vector<32x384xbf16>, vector<384x128xbf16>, vector<32x128xf32> -> vector<32x128xf32>
    %c0_23 = arith.constant 0 : index
    %c0_24 = arith.constant 0 : index
    %58 = vector.load %arg6[%c0_23, %c0_24] : memref<1x8xf32, #tpu.memory_space<vmem>>, vector<1x8xf32>
    %c0_25 = arith.constant 0 : index
    %c0_26 = arith.constant 0 : index
    %59 = vector.load %arg7[%c0_25, %c0_26] : memref<1x8xf32, #tpu.memory_space<vmem>>, vector<1x8xf32>
    %cst_27 = arith.constant dense<0.000000e+00> : vector<128xf32>
    %60 = vector.multi_reduction <add>, %57, %cst_27 [0] : vector<32x128xf32> to vector<128xf32>
    %61 = vector.shape_cast %60 : vector<128xf32> to vector<1x128xf32>
    %62 = arith.mulf %57, %57 : vector<32x128xf32>
    %cst_28 = arith.constant dense<0.000000e+00> : vector<128xf32>
    %63 = vector.multi_reduction <add>, %62, %cst_28 [0] : vector<32x128xf32> to vector<128xf32>
    %64 = vector.shape_cast %63 : vector<128xf32> to vector<1x128xf32>
    %65 = tpu.concatenate %61, %64 in 0 : vector<1x128xf32>, vector<1x128xf32> -> vector<2x128xf32>
    %cst_29 = arith.constant dense<0.000000e+00> : vector<2x8xf32>
    %66 = tpu.matmul %65, %0, %cst_29 {dimension_numbers = #tpu.dot_dimension_numbers<[1], [0], [0], [1], [0, 0, 1, 1], [], []>} : vector<2x128xf32>, vector<128x8xf32>, vector<2x8xf32> -> vector<2x8xf32>
    %67 = vector.extract_strided_slice %66 {offsets = [0, 0], sizes = [1, 8], strides = [1, 1]} : vector<2x8xf32> to vector<1x8xf32>
    %68 = vector.extract_strided_slice %66 {offsets = [1, 0], sizes = [1, 8], strides = [1, 1]} : vector<2x8xf32> to vector<1x8xf32>
    %69 = arith.mulf %67, %67 : vector<1x8xf32>
    %70 = arith.subf %68, %69 : vector<1x8xf32>
    %cst_30 = arith.constant 0.000000e+00 : f32
    %71 = vector.broadcast %cst_30 : f32 to vector<1x8xf32>
    %72 = arith.maximumf %70, %71 : vector<1x8xf32>
    %cst_31 = arith.constant 9.99999974E-6 : f32
    %73 = vector.broadcast %cst_31 : f32 to vector<1x8xf32>
    %74 = arith.addf %72, %73 : vector<1x8xf32>
    %75 = math.rsqrt %74 : vector<1x8xf32>
    %76 = arith.mulf %58, %75 : vector<1x8xf32>
    %77 = arith.mulf %67, %76 : vector<1x8xf32>
    %78 = arith.subf %59, %77 : vector<1x8xf32>
    %79 = tpu.concatenate %76, %78 in 0 : vector<1x8xf32>, vector<1x8xf32> -> vector<2x8xf32>
    %cst_32 = arith.constant dense<0.000000e+00> : vector<2x128xf32>
    %80 = tpu.matmul %79, %1, %cst_32 {dimension_numbers = #tpu.dot_dimension_numbers<[1], [0], [0], [1], [0, 0, 1, 1], [], []>} : vector<2x8xf32>, vector<8x128xf32>, vector<2x128xf32> -> vector<2x128xf32>
    %81 = vector.extract_strided_slice %80 {offsets = [0, 0], sizes = [1, 128], strides = [1, 1]} : vector<2x128xf32> to vector<1x128xf32>
    %82 = vector.broadcast %81 : vector<1x128xf32> to vector<32x128xf32>
    %83 = arith.mulf %57, %82 : vector<32x128xf32>
    %84 = vector.extract_strided_slice %80 {offsets = [1, 0], sizes = [1, 128], strides = [1, 1]} : vector<2x128xf32> to vector<1x128xf32>
    %85 = vector.broadcast %84 : vector<1x128xf32> to vector<32x128xf32>
    %86 = arith.addf %83, %85 : vector<32x128xf32>
    %87 = arith.addf %86, %2 : vector<32x128xf32>
    %cst_33 = arith.constant 0.000000e+00 : f32
    %88 = vector.broadcast %cst_33 : f32 to vector<32x128xf32>
    %89 = arith.maximumf %87, %88 : vector<32x128xf32>
    %c0_34 = arith.constant 0 : index
    %c0_35 = arith.constant 0 : index
    %90 = vector.load %arg10[%c0_34, %c0_35] : memref<32x128xf32, #tpu.memory_space<vmem>>, vector<32x128xf32>
    tpu.vector_store %arg10[%c0_34, %c0_35], %89 {strides = array<i32>} : memref<32x128xf32, #tpu.memory_space<vmem>>, vector<32x128xf32>,
    return
  }
  func.func @transform_0(%arg0: i32) -> (i32, i32) {
    %c0_i32 = arith.constant 0 : i32
    %c0_i32_0 = arith.constant 0 : i32
    %c0_i32_1 = arith.constant 0 : i32
    return %c0_i32, %c0_i32_0 : i32, i32
  }
  func.func @transform_1(%arg0: i32) -> (i32, i32) {
    %c0_i32 = arith.constant 0 : i32
    %c0_i32_0 = arith.constant 0 : i32
    %c0_i32_1 = arith.constant 0 : i32
    return %c0_i32, %c0_i32_0 : i32, i32
  }
  func.func @transform_2(%arg0: i32) -> (i32, i32) {
    %c0_i32 = arith.constant 0 : i32
    %c0_i32_0 = arith.constant 0 : i32
    %c0_i32_1 = arith.constant 0 : i32
    return %c0_i32, %c0_i32_0 : i32, i32
  }
  func.func @transform_3(%arg0: i32) -> (i32, i32) {
    %c0_i32 = arith.constant 0 : i32
    %c0_i32_0 = arith.constant 0 : i32
    %c0_i32_1 = arith.constant 0 : i32
    return %c0_i32, %c0_i32_0 : i32, i32
  }
  func.func @transform_4(%arg0: i32) -> (i32, i32) {
    %c0_i32 = arith.constant 0 : i32
    %c0_i32_0 = arith.constant 0 : i32
    %c0_i32_1 = arith.constant 0 : i32
    return %c0_i32, %c0_i32_0 : i32, i32
  }
  func.func @transform_5(%arg0: i32) -> (i32, i32) {
    %c0_i32 = arith.constant 0 : i32
    %c0_i32_0 = arith.constant 0 : i32
    %c0_i32_1 = arith.constant 0 : i32
    return %c0_i32, %c0_i32_0 : i32, i32
  }
  func.func @transform_6(%arg0: i32) -> (i32, i32) {
    %c0_i32 = arith.constant 0 : i32
    %c0_i32_0 = arith.constant 0 : i32
    %c0_i32_1 = arith.constant 0 : i32
    return %c0_i32, %c0_i32_0 : i32, i32
  }
  func.func @transform_7(%arg0: i32) -> (i32, i32) {
    %c0_i32 = arith.constant 0 : i32
    %c0_i32_0 = arith.constant 0 : i32
    %c0_i32_1 = arith.constant 0 : i32
    return %c0_i32, %c0_i32_0 : i32, i32
  }
  func.func @transform_8(%arg0: i32) -> (i32, i32) {
    %c0_i32 = arith.constant 0 : i32
    %c0_i32_0 = arith.constant 0 : i32
    %c0_i32_1 = arith.constant 0 : i32
    return %c0_i32, %c0_i32_0 : i32, i32
  }
  func.func @transform_9(%arg0: i32) -> (i32, i32) {
    %c0_i32 = arith.constant 0 : i32
    %c0_i32_0 = arith.constant 0 : i32
    %c0_i32_1 = arith.constant 0 : i32
    return %c0_i32, %c0_i32_0 : i32, i32
  }
}

</mosaic_0001>

<bundles_post_ra>
// kernel: residual_forward.1
= control target key start
LH: loop header
LB: loop body
LE: loop exit
PB: predicated region body
PF: predicated region fallthrough
CT: control target
= control target key end

     0   :  { %vm58_vm0 = vcmask 1040384   ;;  %vm71_vm1 = vcmask 1046528   ;;  %vm1580_vm3 = vmmov 1   ;;  %v1581_v51 = vmov 0.0|0.0   ;;  %s2043_s1 = inlined_call_operand.vmem [shape: bf16[384,128], index: 1, kind: input, shape index: {}]   ;;  %s2044_s0 = inlined_call_operand.vmem [shape: f32[32,128], index: 0, kind: input, shape index: {}]   ;;  %s2045_s7 = inlined_call_operand.vmem [shape: f32[128,8], index: 7, kind: input, shape index: {}]   ;;  %s2046_s8 = inlined_call_operand.vmem [shape: f32[8,128], index: 8, kind: input, shape index: {}]   ;;  %s2047_s2 = inlined_call_operand.vmem [shape: bf16[384,128], index: 2, kind: input, shape index: {}]   ;;  %s2048_s3 = inlined_call_operand.vmem [shape: f32[1,8], index: 3, kind: input, shape index: {}]   ;;  %s2049_s4 = inlined_call_operand.vmem [shape: f32[1,8], index: 4, kind: input, shape index: {}]   ;;  %s2050_s5 = inlined_call_operand.vmem [shape: f32[1,8], index: 5, kind: input, shape index: {}]   ;;  %s2051_s6 = inlined_call_operand.vmem [shape: f32[1,8], index: 6, kind: input, shape index: {}]   ;;  %s2052_s9 = inlined_call_operand.vmem [shape: f32[32,128], index: 9, kind: output, shape index: {}]  }
   0x1   :  { %v1528_v0 = vld [vmem:[%s2043_s1 + $0x40] sm:$0xff]   ;;  %v1531_v3 = vld [vmem:[%s2043_s1 + $0x48] sm:$0xff]   ;;  %v1534_v6 = vld [vmem:[%s2043_s1 + $0x50] sm:$0xff]   ;;  %vm1582_vm6 = vmmov 0   ;;  %vm510_vm7 = vcmask 64512  }
   0x2   :  { %v1529_v1 = vld [vmem:[%s2043_s1] sm:$0xff]   ;;  %1241 = vmatprep.subr.bf16.mxu0 %v1528_v0  ;;  %v1532_v4 = vld [vmem:[%s2043_s1 + $0x8] sm:$0xff]   ;;  %v1535_v7 = vld [vmem:[%s2043_s1 + $0x10] sm:$0xff]  }
   0x3   :  { %v1530_v2 = vld [vmem:[%s2043_s1 + $0x80] sm:$0xff]   ;;  %1242 = vmatpush3.bf16.msra.mxu0 %v1529_v1  ;;  %v1533_v5 = vld [vmem:[%s2043_s1 + $0x88] sm:$0xff]   ;;  %v1536_v8 = vld [vmem:[%s2043_s1 + $0x90] sm:$0xff]  }
   0x4   :  { %1355 = vmatprep.subr.bf16.mxu1 %v1530_v2  ;;  %1243 = vmatprep.subr.bf16.mxu0 %v1531_v3  ;;  %v1537_v9 = vld [vmem:[%s2043_s1 + $0x58] sm:$0xff]   ;;  %v1540_v12 = vld [vmem:[%s2043_s1 + $0x60] sm:$0xff]   ;;  %v1543_v15 = vld [vmem:[%s2043_s1 + $0x68] sm:$0xff]  }
   0x5   :  { %1356 = vmatpush3.bf16.msra.mxu1 %v1530_v2  ;;  %v1538_v10 = vld [vmem:[%s2043_s1 + $0x18] sm:$0xff]   ;;  %v1542_v13 = vld [vmem:[%s2043_s1 + $0xa0] sm:$0xff]   ;;  %v1545_v16 = vld [vmem:[%s2043_s1 + $0xa8] sm:$0xff]  }
   0x6   :  { %1357 = vmatprep.subr.bf16.mxu1 %v1533_v5  ;;  %v1539_v11 = vld [vmem:[%s2043_s1 + $0x98] sm:$0xff]   ;;  %v1541_v14 = vld [vmem:[%s2043_s1 + $0x20] sm:$0xff]   ;;  %v1544_v17 = vld [vmem:[%s2043_s1 + $0x28] sm:$0xff]  }
   0x7   :  { %1244 = vmatpush3.bf16.msra.mxu0 %v1532_v4  ;;  %v1546_v18 = vld [vmem:[%s2043_s1 + $0x70] sm:$0xff]   ;;  %v1549_v21 = vld [vmem:[%s2043_s1 + $0x78] sm:$0xff]   ;;  %v1704_v22 = vld [vmem:[%s2044_s0] sm:$0xff] }
   0x8   :  { %1245 = vmatprep.subr.bf16.mxu0 %v1534_v6  ;;  %v1547_v19 = vld [vmem:[%s2043_s1 + $0x30] sm:$0xff]   ;;  %v1709_v23 = vld [vmem:[%s2044_s0 + $0x8] sm:$0xff]  ;;  %v1719_v25 = vld [vmem:[%s2044_s0 + $0x18] sm:$0xff]  ;;  %v59_v26 = vrot.slane %v1704_v22, 7  ;;  %v72_v29 = vrot.slane %v1704_v22, 1 }
   0x9   :  { %1358 = vmatpush3.bf16.msra.mxu1 %v1533_v5  ;;  %v1548_v20 = vld [vmem:[%s2043_s1 + $0xb0] sm:$0xff]   ;;  %v60_v27 = vrot.slane %v1709_v23, 7  ;;  %v85_v28 = vpack.c.bf16 %v1709_v23, %v1704_v22  ;;  %v1551_v30 = vld [vmem:[%s2043_s1 + $0xb8] sm:$0xff]   ;;  %v73_v31 = vrot.slane %v1709_v23, 1  ;;  %v76_v33 = vrot.slane %v1719_v25, 1  ;;  %vm1187_vm2 = vmneg %vm58_vm0 }
   0xa   :  { %1359 = vmatprep.subr.bf16.mxu1 %v1536_v8  ;;  %v1714_v24 = vld [vmem:[%s2044_s0 + $0x10] sm:$0xff]  ;;  %v1550_v34 = vld [vmem:[%s2043_s1 + $0x38] sm:$0xff]   ;;  %vm1739_vm4 = vmpackc.low %vm71_vm1, %vm1580_vm3  ;;  %v63_v44 = vrot.slane %v1719_v25, 7 }
   0xb   :  { %1246 = vmatpush3.bf16.msra.mxu0 %v1535_v7  ;;  %v75_v32 = vrot.slane %v1714_v24, 1  ;;  %314 = vmatprep.mubr.bf16.mxu0 %v85_v28  ;;  %v61_v35 = vsel %vm58_vm0, %v59_v26, %v60_v27  ;;  %v74_v36 = vsel %vm71_vm1, %v72_v29, %v73_v31  ;;  %vm1744_vm5 = vmpackc.low %vm1580_vm3, %vm1187_vm2  ;;  %v88_v42 = vpack.c.bf16 %v1719_v25, %v1714_v24  ;;  %v33_v48 = vld [vmem:[%s2045_s7] sm:$0xff]  ;;  %v34_v49 = vld [vmem:[%s2045_s7 + $0x8] sm:$0xff] }
   0xc   :  { %1247 = vmatprep.subr.bf16.mxu0 %v1537_v9  ;;  %v1196_v38 = vpack.c.bf16 %v73_v31, %v74_v36  ;;  %v1189_v40 = vpack.c.bf16 %v61_v35, %v59_v26  ;;  %v62_v43 = vrot.slane %v1714_v24, 7  ;;  %v1767_v50 = vpack.c.bf16 %v34_v49, %v33_v48  ;;  %v35_v52 = vld [vmem:[%s2045_s7 + $0x10] sm:$0xff]  ;;  %v36_v53 = vld [vmem:[%s2045_s7 + $0x18] sm:$0xff]  ;;  %v37_v55 = vld [vmem:[%s2045_s7 + $0x20] sm:$0xff] }
   0xd   :  { %1360 = vmatpush3.bf16.msra.mxu1 %v1536_v8  ;;  %v77_v39 = vsel %vm71_vm1, %v75_v32, %v76_v33  ;;  %v1778_v54 = vpack.c.bf16 %v36_v53, %v35_v52  ;;  %v38_v56 = vld [vmem:[%s2045_s7 + $0x28] sm:$0xff]  ;;  %v39_v58 = vld [vmem:[%s2045_s7 + $0x30] sm:$0xff]  ;;  %v40_v59 = vld [vmem:[%s2045_s7 + $0x38] sm:$0xff]  ;;  %v1583_v8 = vmov 0.0  }
   0xe   :  { %1361 = vmatprep.subr.bf16.mxu1 %v1539_v11  ;;  %1371 = vmatprep.mubr.msk.bf16.mxu1 %vm1739_vm4, %v1196_v38  ;;  %v1199_v45 = vpack.c.bf16 %v76_v33, %v77_v39  ;;  %v64_v46 = vsel %vm58_vm0, %v62_v43, %v63_v44  ;;  %v1788_v57 = vpack.c.bf16 %v38_v56, %v37_v55  ;;  %v41_v61 = vld [vmem:[%s2045_s7 + $0x40] sm:$0xff]  ;;  %v42_v62 = vld [vmem:[%s2045_s7 + $0x48] sm:$0xff]  ;;  %v43_v0 = vld [vmem:[%s2045_s7 + $0x50] sm:$0xff] }
   0xf   :  { %1248 = vmatpush3.bf16.msra.mxu0 %v1538_v10  ;;  %v1193_v47 = vpack.c.bf16 %v64_v46, %v62_v43  ;;  %v1798_v60 = vpack.c.bf16 %v40_v59, %v39_v58  ;;  %v1808_v63 = vpack.c.bf16 %v42_v62, %v41_v61  ;;  %v44_v1 = vld [vmem:[%s2045_s7 + $0x58] sm:$0xff]  ;;  %v45_v3 = vld [vmem:[%s2045_s7 + $0x60] sm:$0xff]  ;;  %v46_v4 = vld [vmem:[%s2045_s7 + $0x68] sm:$0xff] }
  0x10   :  { %1249 = vmatprep.subr.bf16.mxu0 %v1540_v12  ;;  %v1818_v2 = vpack.c.bf16 %v44_v1, %v43_v0  ;;  %v1828_v5 = vpack.c.bf16 %v46_v4, %v45_v3  ;;  %v47_v6 = vld [vmem:[%s2045_s7 + $0x70] sm:$0xff]  ;;  %v48_v7 = vld [vmem:[%s2045_s7 + $0x78] sm:$0xff]  ;;  %v1870_v1 = vld [vmem:[%s2046_s8] sm:$0xff] }
  0x11   :  { %1362 = vmatpush3.bf16.msra.mxu1 %v1539_v11  ;;  %v1840_v9 = vpack.c.bf16 %v48_v7, %v47_v6  ;;  %v1552_v3 = vld [vmem:[%s2047_s2 + $0x40] sm:$0xff]   ;;  %v1557_v6 = vld [vmem:[%s2047_s2 + $0x88] sm:$0xff]   ;;  %v1560_v7 = vld [vmem:[%s2047_s2 + $0x90] sm:$0xff]  }
  0x12   :  { %1363 = vmatprep.subr.bf16.mxu1 %v1542_v13  ;;  %v1554_v4 = vld [vmem:[%s2047_s2 + $0x80] sm:$0xff]  }
  0x13   :  { %1250 = vmatpush3.bf16.msra.mxu0 %v1541_v14 }
  0x14   :  { %1251 = vmatprep.subr.bf16.mxu0 %v1543_v15 }
  0x15   :  { %1364 = vmatpush3.bf16.msra.mxu1 %v1542_v13 }
  0x16   :  { %1365 = vmatprep.subr.bf16.mxu1 %v1545_v16 }
  0x17   :  { %1252 = vmatpush3.bf16.msra.mxu0 %v1544_v17 }
  0x18   :  { %1253 = vmatprep.subr.bf16.mxu0 %v1546_v18 }
  0x19   :  { %1366 = vmatpush3.bf16.msra.mxu1 %v1545_v16 }
  0x1a   :  { %1367 = vmatprep.subr.bf16.mxu1 %v1548_v20 }
  0x1b   :  { %1254 = vmatpush3.bf16.msra.mxu0 %v1547_v19 }
  0x1c   :  { %1255 = vmatprep.subr.bf16.mxu0 %v1549_v21 }
  0x1d   :  { %1368 = vmatpush3.bf16.msra.mxu1 %v1548_v20 }
  0x1e   :  { %1369 = vmatprep.subr.bf16.mxu1 %v1551_v30 }
  0x1f   :  { %1256 = vmatpush3.bf16.msra.mxu0 %v1550_v34 }
  0x20   :  { %1475 = vmatprep.subr.bf16.mxu0 %v1581_v51 }
  0x21   :  { %1370 = vmatpush3.bf16.msra.mxu1 %v1551_v30 }
  0x22   :  { %1190 = vmatmul.mubr.msk.bf16.vlgmr.msra.gmra.mrb[0].mxu0 %vm1744_vm5, %v1189_v40  ;;  %1410 = vmatprep.subr.mxu1 %v1583_v8 }
  0x23   :  { %322 = vmatprep.mubr.bf16.mxu0 %v88_v42  ;;  %1477 = vmatpush3.bf16.msra.mxu0 %v1767_v50 }
  0x24   :  { %1372 = vmatmul.mubr.msk.bf16.vlgmr.msra.gmra.mrb[0].mxu1 %vm1739_vm4, %v1199_v45  ;;  %1478 = vmatprep.subr.bf16.mxu0 %v1581_v51 }
  0x25   :  { %1412 = vmatprep.mubr.msk.f32.mxu1 %vm1582_vm6, %v1583_v8  ;;  %1411 = vmatpush3.msra.mxu1 %v1870_v1 }
  0x26   :  { %1298 = vmatprep.subr.bf16.mxu1 %v1552_v3  ;;  %v1570_v3 = vld [vmem:[%s2047_s2 + $0x70] sm:$0xff]  }
  0x27   :  { %1480 = vmatpush3.bf16.msra.mxu0 %v1778_v54 }
  0x28   :  { %1481 = vmatprep.subr.bf16.mxu0 %v1581_v51 }
  0x2a   :  { %1194 = vmatmul.mubr.msk.bf16.gmra.mrb[4].mxu0 %vm1744_vm5, %v1193_v47 }
  0x2b   :  { %1483 = vmatpush3.bf16.msra.mxu0 %v1788_v57  ;;  %1407 = vmatprep.mubr.msk.f32.mxu0 %vm1582_vm6, %v1583_v8 }
  0x2c   :  { %1484 = vmatprep.subr.bf16.mxu0 %v1581_v51 }
  0x2f   :  { %1486 = vmatpush3.bf16.msra.mxu0 %v1798_v60 }
  0x30   :  { %1487 = vmatprep.subr.bf16.mxu0 %v1581_v51 }
  0x33   :  { %1489 = vmatpush3.bf16.msra.mxu0 %v1808_v63 }
  0x34   :  { %1490 = vmatprep.subr.bf16.mxu0 %v1581_v51 }
  0x37   :  { %1492 = vmatpush3.bf16.msra.mxu0 %v1818_v2 }
  0x38   :  { %1493 = vmatprep.subr.bf16.mxu0 %v1581_v51 }
  0x3b   :  { %1495 = vmatpush3.bf16.msra.mxu0 %v1828_v5 }
  0x3c   :  { %1496 = vmatprep.subr.bf16.mxu0 %v1581_v51 }
  0x3f   :  { %1498 = vmatpush3.bf16.msra.mxu0 %v1840_v9 }
  0x40   :  { %1415 = vmatprep.subr.bf16.mxu0 %v1554_v4 }
  0xf5   :  { %v1257_v10 = vpop.f32.mrb[0].mxu0 }
  0xf6   :  { %v1258_v11 = vpop.f32.mrb[1].mxu0 }
  0xf7   :  { %v1259_v12 = vadd.f32 %v1258_v11, %v1257_v10  ;;  %v1260_v13 = vpop.f32.mrb[2].mxu0  ;;  %v1373_v14 = vpop.f32.mrb[0].mxu1  ;;  %v1563_v10 = vld [vmem:[%s2047_s2 + $0x98] sm:$0xff]   ;;  %v1566_v11 = vld [vmem:[%s2047_s2 + $0xa0] sm:$0xff]  }
  0xf8   :  { %v1261_v15 = vpop.f32.mrb[3].mxu0  ;;  %v365_v16 = vpop.f32.mrb[1].mxu1 }
  0xf9   :  { %v1262_v17 = vadd.f32 %v1261_v15, %v1260_v13  ;;  %v1846_v18 = vadd.f32 %v1259_v12, %v365_v16  ;;  %v1374_v19 = vpop.f32.mrb[2].mxu1 }
  0xfa   :  { %v368_v20 = vpop.f32.mrb[3].mxu1 }
  0xfb   :  { %v1848_v21 = vadd.f32 %v1262_v17, %v368_v20  ;;  %v391_v32 = vmul.f32 %v1846_v18, %v1846_v18  ;;  %v1584_v20 = vmov 1966171168  }
  0xfd   :  { %v1263_v26 = vpop.f32.mrb[4].mxu0  ;;  %v392_v28 = vmul.f32 %v1848_v21, %v1848_v21  ;;  %v382_v33 = vadd.f32 %v1848_v21, %v1846_v18 }
  0xfe   :  { %v1264_v27 = vpop.f32.mrb[5].mxu0 }
  0xff   :  { %v1265_v29 = vadd.f32 %v1264_v27, %v1263_v26  ;;  %v1266_v30 = vpop.f32.mrb[6].mxu0  ;;  %v395_v36 = vadd.f32 %v392_v28, %v391_v32  ;;  %v485_v26 = vunpack.c.l.s4 %v1584_v20  ;;  %v487_v27 = vlaneseq }
 0x100   :  { %v1267_v31 = vpop.f32.mrb[7].mxu0 }
 0x101   :  { %v1856_v34 = vadd.f32 %v1373_v14, %v1265_v29  ;;  %v1268_v35 = vadd.f32 %v1267_v31, %v1266_v30  ;;  %v486_v28 = vunpack.c.0.s8 %v485_v26  ;;  %v1891_v29 = vshrl.u32 %v487_v27, 7 }
 0x103   :  { %v383_v38 = vadd.f32 %v382_v33, %v1856_v34  ;;  %v393_v39 = vmul.f32 %v1856_v34, %v1856_v34  ;;  %v1861_v40 = vadd.f32 %v1374_v19, %v1268_v35  ;;  %v1894_v30 = vsub.s32 %v486_v28, %v1891_v29  ;;  %v380_v35 = vld [vmem:[%s2048_s3] sm:$0x1] }
 0x105   :  { %v396_v42 = vadd.f32 %v395_v36, %v393_v39  ;;  %v384_v43 = vadd.f32 %v383_v38, %v1861_v40  ;;  %v394_v44 = vmul.f32 %v1861_v40, %v1861_v40  ;;  %v381_v39 = vld [vmem:[%s2049_s4] sm:$0x1] }
 0x107   :  { %v385_v45 = vrot.slane %v384_v43, 4  ;;  %v397_v46 = vadd.f32 %v396_v42, %v394_v44 }
 0x109   :  { %v386_v47 = vadd.f32 %v385_v45, %v384_v43  ;;  %v398_v48 = vrot.slane %v397_v46, 4  ;;  %v1905_v43 = vsub.s32 0, %v1891_v29 }
 0x10b   :  { %v387_v49 = vrot.slane %v386_v47, 2  ;;  %v399_v52 = vadd.f32 %v398_v48, %v397_v46  ;;  %v1553_v46 = vld [vmem:[%s2047_s2] sm:$0xff]  }
 0x10d   :  { %v388_v53 = vadd.f32 %v387_v49, %v386_v47  ;;  %v400_v55 = vrot.slane %v399_v52, 2  ;;  %v1555_v47 = vld [vmem:[%s2047_s2 + $0x48] sm:$0xff]  }
 0x10e   :  { %v1556_v49 = vld [vmem:[%s2047_s2 + $0x8] sm:$0xff]  }
 0x10f   :  { %v389_v56 = vrot.slane %v388_v53, 1  ;;  %v401_v58 = vadd.f32 %v400_v55, %v399_v52  ;;  %v1558_v52 = vld [vmem:[%s2047_s2 + $0x50] sm:$0xff]   ;;  %v1561_v55 = vld [vmem:[%s2047_s2 + $0x58] sm:$0xff]  }
 0x111   :  { %v402_v59 = vrot.slane %v401_v58, 1  ;;  %v390_v61 = vadd.f32 %v389_v56, %v388_v53  ;;  %v1559_v53 = vld [vmem:[%s2047_s2 + $0x10] sm:$0xff]   ;;  %v1562_v56 = vld [vmem:[%s2047_s2 + $0x18] sm:$0xff]  }
 0x113   :  { %v403_v62 = vadd.f32 %v402_v59, %v401_v58  ;;  %v1564_v58 = vld [vmem:[%s2047_s2 + $0x60] sm:$0xff]  }
 0x114   :  { %v1565_v59 = vld [vmem:[%s2047_s2 + $0x20] sm:$0xff]  }
 0x115   :  { %v404_v0 = vsel %vm58_vm0, %v390_v61, %v403_v62  ;;  %v1567_v61 = vld [vmem:[%s2047_s2 + $0x68] sm:$0xff]  }
 0x116   :  { %1408 = vmatmul.mubr.f32.vlgmr.msra.gmra.mrb[8].mxu0 %v404_v0  ;;  %v1568_v62 = vld [vmem:[%s2047_s2 + $0x28] sm:$0xff]  }
 0x117   :  { %1416 = vmatpush3.bf16.msra.mxu0 %v1554_v4  ;;  %v1569_v0 = vld [vmem:[%s2047_s2 + $0xa8] sm:$0xff]   ;;  %v1571_v4 = vld [vmem:[%s2047_s2 + $0x30] sm:$0xff]  }
 0x118   :  { %1417 = vmatprep.subr.bf16.mxu0 %v1557_v6 }
 0x11b   :  { %1418 = vmatpush3.bf16.msra.mxu0 %v1557_v6  ;;  %v1572_v6 = vld [vmem:[%s2047_s2 + $0xb0] sm:$0xff]  }
 0x11c   :  { %1419 = vmatprep.subr.bf16.mxu0 %v1560_v7 }
 0x11f   :  { %1420 = vmatpush3.bf16.msra.mxu0 %v1560_v7  ;;  %v1573_v7 = vld [vmem:[%s2047_s2 + $0x78] sm:$0xff]  }
 0x120   :  { %1421 = vmatprep.subr.bf16.mxu0 %v1563_v10 }
 0x123   :  { %1422 = vmatpush3.bf16.msra.mxu0 %v1563_v10  ;;  %v1574_v10 = vld [vmem:[%s2047_s2 + $0x38] sm:$0xff]  }
 0x124   :  { %1423 = vmatprep.subr.bf16.mxu0 %v1566_v11 }
 0x127   :  { %1424 = vmatpush3.bf16.msra.mxu0 %v1566_v11  ;;  %v1575_v11 = vld [vmem:[%s2047_s2 + $0xb8] sm:$0xff]  }
 0x128   :  { %1425 = vmatprep.subr.bf16.mxu0 %v1569_v0 }
 0x12b   :  { %1426 = vmatpush3.bf16.msra.mxu0 %v1569_v0 }
 0x12c   :  { %1427 = vmatprep.subr.bf16.mxu0 %v1572_v6 }
 0x12f   :  { %1428 = vmatpush3.bf16.msra.mxu0 %v1572_v6 }
 0x130   :  { %1429 = vmatprep.subr.bf16.mxu0 %v1575_v11 }
 0x133   :  { %1430 = vmatpush3.bf16.msra.mxu0 %v1575_v11 }
 0x134   :  { %1470 = vmatprep.subr.mxu0 %v1583_v8 }
 0x1e9   :  { %v471_v12 = vpop.f32.mrb[8].mxu0 }
 0x1ea   :  { %v475_v13 = vmul.f32 %v471_v12, %v471_v12  ;;  %v1409_v14 = vpop.f32.mrb[9].mxu0 }
 0x1ec   :  { %v477_v15 = vrot.slane %v475_v13, 7 }
 0x1ee   :  { %v479_v16 = vsub.f32 %v471_v12, %v477_v15 }
 0x1f0   :  { %v480_v17 = vmax.f32 %v479_v16, 0.0 }
 0x1f2   :  { %v481_v19 = vadd.f32 1e-05, %v480_v17 }
 0x1f4   :  { %1576 = vrsqrt.f32 %v481_v19 }
 0x1fe   :  { %v1577_v31 = vpop.eup %1576 }
 0x1ff   :  { %v490_v32 = vrot.slane %v1577_v31, %v1894_v30 }
 0x201   :  { %v491_v33 = vcombine.high %v490_v32, %v490_v32 }
 0x203   :  { %v498_v36 = vrot.slane %v491_v33, %v1894_v30 }
 0x205   :  { %v500_v38 = vmul.f32 %v498_v36, %v380_v35 }
 0x207   :  { %v501_v42 = vmul.f32 %v500_v38, %v471_v12  ;;  %v594_v12 = vsub.s32 1, %v1891_v29 }
 0x209   :  { %v502_v44 = vsub.f32 %v381_v39, %v501_v42 }
 0x20b   :  { %v507_v45 = vrot.slane %v502_v44, %v1905_v43 }
 0x20d   :  { %v509_v48 = vsel %vm58_vm0, %v500_v38, %v507_v45 }
 0x20e   :  { %1413 = vmatmul.mubr.msk.f32.vlgmr.msra.gmra.mrb[4].mxu1 %vm510_vm7, %v509_v48 }
 0x20f   :  { %1299 = vmatpush3.bf16.msra.mxu1 %v1553_v46 }
 0x210   :  { %1300 = vmatprep.subr.bf16.mxu1 %v1555_v47 }
 0x213   :  { %1301 = vmatpush3.bf16.msra.mxu1 %v1556_v49 }
 0x214   :  { %1302 = vmatprep.subr.bf16.mxu1 %v1558_v52 }
 0x217   :  { %1303 = vmatpush3.bf16.msra.mxu1 %v1559_v53 }
 0x218   :  { %1304 = vmatprep.subr.bf16.mxu1 %v1561_v55 }
 0x21b   :  { %1305 = vmatpush3.bf16.msra.mxu1 %v1562_v56 }
 0x21c   :  { %1306 = vmatprep.subr.bf16.mxu1 %v1564_v58 }
 0x21f   :  { %1307 = vmatpush3.bf16.msra.mxu1 %v1565_v59 }
 0x220   :  { %1308 = vmatprep.subr.bf16.mxu1 %v1567_v61 }
 0x223   :  { %1309 = vmatpush3.bf16.msra.mxu1 %v1568_v62 }
 0x224   :  { %1310 = vmatprep.subr.bf16.mxu1 %v1570_v3 }
 0x227   :  { %1311 = vmatpush3.bf16.msra.mxu1 %v1571_v4 }
 0x228   :  { %1312 = vmatprep.subr.bf16.mxu1 %v1573_v7 }
 0x22b   :  { %1313 = vmatpush3.bf16.msra.mxu1 %v1574_v10 }
 0x22c   :  { %1499 = vmatprep.subr.bf16.mxu1 %v1581_v51 }
 0x2e1   :  { %v580_v13 = vpop.f32.mrb[4].mxu1 }
 0x2e2   :  { %v587_v14 = vrot.slane %v580_v13, %v1905_v43  ;;  %v1414_v15 = vpop.f32.mrb[5].mxu1  ;;  %v595_v16 = vrot.slane %v580_v13, %v594_v12 }
 0x2e4   :  { %v588_v17 = vmul.f32 %v587_v14, %v1846_v18  ;;  %v589_v19 = vmul.f32 %v587_v14, %v1848_v21  ;;  %v590_v20 = vmul.f32 %v587_v14, %v1856_v34  ;;  %v591_v26 = vmul.f32 %v587_v14, %v1861_v40 }
 0x2e6   :  { %v596_v27 = vadd.f32 %v595_v16, %v588_v17  ;;  %v597_v28 = vadd.f32 %v595_v16, %v589_v19  ;;  %v598_v31 = vadd.f32 %v595_v16, %v590_v20  ;;  %v599_v32 = vadd.f32 %v595_v16, %v591_v26 }
 0x2e8   :  { %v600_v33 = vmax.f32 %v596_v27, 0.0  ;;  %v601_v35 = vmax.f32 %v597_v28, 0.0  ;;  %v602_v36 = vmax.f32 %v598_v31, 0.0  ;;  %v603_v38 = vmax.f32 %v599_v32, 0.0 }
 0x2ea   :  { %v608_v39 = vrot.slane %v600_v33, 7  ;;  %v609_v42 = vrot.slane %v601_v35, 7  ;;  %v633_v44 = vpack.c.bf16 %v601_v35, %v600_v33  ;;  %v620_v45 = vrot.slane %v600_v33, 1 }
 0x2eb   :  { %v621_v46 = vrot.slane %v601_v35, 1  ;;  %v623_v18 = vrot.slane %v602_v36, 1  ;;  %v624_v47 = vrot.slane %v603_v38, 1  ;;  %v636_v48 = vpack.c.bf16 %v603_v38, %v602_v36 }
 0x2ec   :  { %862 = vmatprep.mubr.bf16.mxu1 %v633_v44  ;;  %v610_v21 = vsel %vm58_vm0, %v608_v39, %v609_v42  ;;  %v611_v55 = vrot.slane %v602_v36, 7  ;;  %v612_v56 = vrot.slane %v603_v38, 7 }
 0x2ed   :  { %v1228_v34 = vpack.c.bf16 %v610_v21, %v608_v39  ;;  %v622_v40 = vsel %vm71_vm1, %v620_v45, %v621_v46  ;;  %v625_v49 = vsel %vm71_vm1, %v623_v18, %v624_v47 }
 0x2ee   :  { %v1235_v52 = vpack.c.bf16 %v621_v46, %v622_v40  ;;  %v1238_v53 = vpack.c.bf16 %v624_v47, %v625_v49  ;;  %v613_v58 = vsel %vm58_vm0, %v611_v55, %v612_v56  ;;  %v928_v56 = vld [vmem:[%s2050_s5] sm:$0x1] }
 0x2ef   :  { %1229 = vmatmul.mubr.msk.bf16.vlgmr.msra.gmra.mrb[8].mxu1 %vm1744_vm5, %v1228_v34  ;;  %v1232_v59 = vpack.c.bf16 %v613_v58, %v611_v55 }
 0x2f0   :  { %1431 = vmatprep.mubr.msk.bf16.mxu0 %vm1739_vm4, %v1235_v52  ;;  %870 = vmatprep.mubr.bf16.mxu1 %v636_v48 }
 0x2f1   :  { %1432 = vmatmul.mubr.msk.bf16.vlgmr.msra.gmra.mrb[12].mxu0 %vm1739_vm4, %v1238_v53  ;;  %1501 = vmatpush3.bf16.msra.mxu1 %v1767_v50 }
 0x2f2   :  { %1502 = vmatprep.subr.bf16.mxu1 %v1581_v51  ;;  %1471 = vmatpush3.msra.mxu0 %v1870_v1 }
 0x2f3   :  { %1472 = vmatprep.mubr.msk.f32.mxu0 %vm1582_vm6, %v1583_v8 }
 0x2f5   :  { %1504 = vmatpush3.bf16.msra.mxu1 %v1778_v54 }
 0x2f6   :  { %1505 = vmatprep.subr.bf16.mxu1 %v1581_v51 }
 0x2f7   :  { %1233 = vmatmul.mubr.msk.bf16.gmra.mrb[12].mxu1 %vm1744_vm5, %v1232_v59 }
 0x2f8   :  { %1467 = vmatprep.mubr.msk.f32.mxu1 %vm1582_vm6, %v1583_v8 }
 0x2f9   :  { %1507 = vmatpush3.bf16.msra.mxu1 %v1788_v57 }
 0x2fa   :  { %1508 = vmatprep.subr.bf16.mxu1 %v1581_v51 }
 0x2fd   :  { %1510 = vmatpush3.bf16.msra.mxu1 %v1798_v60 }
 0x2fe   :  { %1511 = vmatprep.subr.bf16.mxu1 %v1581_v51 }
 0x301   :  { %1513 = vmatpush3.bf16.msra.mxu1 %v1808_v63 }
 0x302   :  { %1514 = vmatprep.subr.bf16.mxu1 %v1581_v51 }
 0x305   :  { %1516 = vmatpush3.bf16.msra.mxu1 %v1818_v2 }
 0x306   :  { %1517 = vmatprep.subr.bf16.mxu1 %v1581_v51 }
 0x309   :  { %1519 = vmatpush3.bf16.msra.mxu1 %v1828_v5 }
 0x30a   :  { %1520 = vmatprep.subr.bf16.mxu1 %v1581_v51 }
 0x30d   :  { %1522 = vmatpush3.bf16.msra.mxu1 %v1840_v9 }
 0x3c2   :  { %v1314_v37 = vpop.f32.mrb[8].mxu1 }
 0x3c3   :  { %v1315_v41 = vpop.f32.mrb[9].mxu1 }
 0x3c4   :  { %v1316_v50 = vadd.f32 %v1315_v41, %v1314_v37  ;;  %v1433_v54 = vpop.f32.mrb[12].mxu0  ;;  %v1317_v57 = vpop.f32.mrb[10].mxu1  ;;  %v929_v37 = vld [vmem:[%s2051_s6] sm:$0x1] }
 0x3c5   :  { %v913_v60 = vpop.f32.mrb[13].mxu0  ;;  %v1318_v8 = vpop.f32.mrb[11].mxu1 }
 0x3c6   :  { %v2006_v63 = vadd.f32 %v1316_v50, %v913_v60  ;;  %v1319_v1 = vadd.f32 %v1318_v8, %v1317_v57  ;;  %v1434_v61 = vpop.f32.mrb[14].mxu0 }
 0x3c7   :  { %v916_v2 = vpop.f32.mrb[15].mxu0 }
 0x3c8   :  { %v917_v62 = vadd.f32 %v1319_v1, %v916_v2  ;;  %v939_v9 = vmul.f32 %v2006_v63, %v2006_v63 }
 0x3ca   :  { %v1320_v0 = vpop.f32.mrb[12].mxu1  ;;  %v940_v5 = vmul.f32 %v917_v62, %v917_v62  ;;  %v930_v7 = vadd.f32 %v917_v62, %v2006_v63 }
 0x3cb   :  { %v1321_v3 = vpop.f32.mrb[13].mxu1 }
 0x3cc   :  { %v1322_v4 = vadd.f32 %v1321_v3, %v1320_v0  ;;  %v1323_v51 = vpop.f32.mrb[14].mxu1  ;;  %v943_v13 = vadd.f32 %v940_v5, %v939_v9 }
 0x3cd   :  { %v1324_v6 = vpop.f32.mrb[15].mxu1 }
 0x3ce   :  { %v922_v10 = vadd.f32 %v1433_v54, %v1322_v4  ;;  %v1325_v11 = vadd.f32 %v1324_v6, %v1323_v51 }
 0x3d0   :  { %v931_v14 = vadd.f32 %v930_v7, %v922_v10  ;;  %v941_v15 = vmul.f32 %v922_v10, %v922_v10  ;;  %v925_v16 = vadd.f32 %v1434_v61, %v1325_v11 }
 0x3d2   :  { %v944_v17 = vadd.f32 %v943_v13, %v941_v15  ;;  %v932_v19 = vadd.f32 %v931_v14, %v925_v16  ;;  %v942_v20 = vmul.f32 %v925_v16, %v925_v16 }
 0x3d4   :  { %v933_v26 = vrot.slane %v932_v19, 4  ;;  %v945_v27 = vadd.f32 %v944_v17, %v942_v20 }
 0x3d6   :  { %v934_v28 = vadd.f32 %v933_v26, %v932_v19  ;;  %v946_v31 = vrot.slane %v945_v27, 4 }
 0x3d8   :  { %v935_v32 = vrot.slane %v934_v28, 2  ;;  %v947_v33 = vadd.f32 %v946_v31, %v945_v27 }
 0x3da   :  { %v936_v35 = vadd.f32 %v935_v32, %v934_v28  ;;  %v948_v36 = vrot.slane %v947_v33, 2 }
 0x3dc   :  { %v937_v38 = vrot.slane %v936_v35, 1  ;;  %v949_v39 = vadd.f32 %v948_v36, %v947_v33 }
 0x3de   :  { %v950_v42 = vrot.slane %v949_v39, 1  ;;  %v938_v44 = vadd.f32 %v937_v38, %v936_v35 }
 0x3e0   :  { %v951_v45 = vadd.f32 %v950_v42, %v949_v39 }
 0x3e2   :  { %v952_v46 = vsel %vm58_vm0, %v938_v44, %v951_v45 }
 0x3e3   :  { %1468 = vmatmul.mubr.f32.vlgmr.msra.gmra.mrb[6].mxu1 %v952_v46 }
 0x4b6   :  { %v1019_v18 = vpop.f32.mrb[6].mxu1 }
 0x4b7   :  { %v1023_v47 = vmul.f32 %v1019_v18, %v1019_v18  ;;  %v1469_v21 = vpop.f32.mrb[7].mxu1 }
 0x4b9   :  { %v1025_v34 = vrot.slane %v1023_v47, 7 }
 0x4bb   :  { %v1027_v40 = vsub.f32 %v1019_v18, %v1025_v34 }
 0x4bd   :  { %v1028_v48 = vmax.f32 %v1027_v40, 0.0 }
 0x4bf   :  { %v1029_v49 = vadd.f32 1e-05, %v1028_v48 }
 0x4c1   :  { %1578 = vrsqrt.f32 %v1029_v49 }
 0x4cb   :  { %v1579_v52 = vpop.eup %1578 }
 0x4cc   :  { %v1038_v53 = vrot.slane %v1579_v52, %v1894_v30 }
 0x4ce   :  { %v1039_v55 = vcombine.high %v1038_v53, %v1038_v53 }
 0x4d0   :  { %v1046_v58 = vrot.slane %v1039_v55, %v1894_v30 }
 0x4d2   :  { %v1048_v59 = vmul.f32 %v1046_v58, %v928_v56 }
 0x4d4   :  { %v1049_v41 = vmul.f32 %v1048_v59, %v1019_v18 }
 0x4d6   :  { %v1050_v50 = vsub.f32 %v929_v37, %v1049_v41 }
 0x4d8   :  { %v1055_v54 = vrot.slane %v1050_v50, %v1905_v43 }
 0x4da   :  { %v1057_v57 = vsel %vm58_vm0, %v1048_v59, %v1055_v54 }
 0x4db   :  { %1473 = vmatmul.mubr.msk.f32.vlgmr.msra.gmra.mrb[10].mxu0 %vm510_vm7, %v1057_v57 }
 0x5ae   :  { %v1127_v60 = vpop.f32.mrb[10].mxu0 }
 0x5af   :  { %v1134_v8 = vrot.slane %v1127_v60, %v1905_v43  ;;  %v1474_v1 = vpop.f32.mrb[11].mxu0  ;;  %v1142_v30 = vrot.slane %v1127_v60, %v594_v12 }
 0x5b1   :  { %v1135_v61 = vmul.f32 %v1134_v8, %v2006_v63  ;;  %v1136_v2 = vmul.f32 %v1134_v8, %v917_v62  ;;  %v1137_v0 = vmul.f32 %v1134_v8, %v922_v10  ;;  %v1138_v3 = vmul.f32 %v1134_v8, %v925_v16 }
 0x5b3   :  { %v1143_v5 = vadd.f32 %v1142_v30, %v1135_v61  ;;  %v1144_v4 = vadd.f32 %v1142_v30, %v1136_v2  ;;  %v1145_v51 = vadd.f32 %v1142_v30, %v1137_v0  ;;  %v1146_v6 = vadd.f32 %v1142_v30, %v1138_v3 }
 0x5b5   :  { %v1147_v9 = vadd.f32 %v1143_v5, %v1704_v22  ;;  %v1148_v7 = vadd.f32 %v1144_v4, %v1709_v23  ;;  %v1149_v11 = vadd.f32 %v1145_v51, %v1714_v24  ;;  %v1150_v43 = vadd.f32 %v1146_v6, %v1719_v25 }
 0x5b7   :  { %v1151_v13 = vmax.f32 %v1147_v9, 0.0  ;;  %v1152_v29 = vmax.f32 %v1148_v7, 0.0  ;;  %v1153_v12 = vmax.f32 %v1149_v11, 0.0  ;;  %v1154_v14 = vmax.f32 %v1150_v43, 0.0 }
 0x5b9   :  { %1155 = vst [vmem:[%s2052_s9] sm:$0xff] %v1151_v13  ;;  %1156 = vst [vmem:[%s2052_s9 + $0x8] sm:$0xff] %v1152_v29 }
 0x5ba   :  { %1157 = vst [vmem:[%s2052_s9 + $0x10] sm:$0xff] %v1153_v12  ;;  %1158 = vst [vmem:[%s2052_s9 + $0x18] sm:$0xff] %v1154_v14 }

</bundles_post_ra>
